<compile_context>
chip_gen: v7x
topology: tpu7x:2x2x1
jax: 0.10.0
libtpu: 0.0.40
codegen_flags: <defaults>
</compile_context>

<pallas_src>
import functools
import math

import jax
import jax.numpy as jnp
from jax import lax
from jax.experimental import pallas as pl
from jax.experimental.pallas import tpu as pltpu


def _pick_tile(dim, target, align):
    """Largest t <= target with dim % t == 0 and t % align == 0; else dim."""
    if dim <= target:
        return dim
    t = (target // align) * align
    while t >= align:
        if dim % t == 0:
            return t
        t -= align
    return dim


@functools.lru_cache(maxsize=None)
def _vmem_limit_bytes():
    """~75% of physical VMEM: v5e/v6e (128 MiB) -> 96 MiB, v7x (64 MiB) -> 48 MiB."""
    cap = None
    try:
        cap = getattr(pltpu.get_tpu_info(), "vmem_capacity_bytes", None)
    except Exception:
        cap = None
    if not cap:
        cap = 64 * 1024 * 1024            # conservative (v7x) fallback
    return min(int(cap) * 3 // 4, 110 * 1024 * 1024)


# ---------------------------------------------------------------------------
# Kernel 1: tiled dense layer  y = x @ W^T + b   (PyTorch nn.Linear semantics)
# ---------------------------------------------------------------------------
def _linear_kernel(x_ref, w_ref, b_ref, o_ref, acc_ref):
    k = pl.program_id(2)

    @pl.when(k == 0)
    def _init():
        acc_ref[...] = jnp.zeros_like(acc_ref)

    # x_ref: (tm, tk), w_ref: (tn, tk)  -- PyTorch (N, K) weight used as-is;
    # contract K of both operands (no transpose anywhere), fp32 accumulation.
    acc_ref[...] += lax.dot_general(
        x_ref[...], w_ref[...], (((1,), (1,)), ((), ())),
        preferred_element_type=jnp.float32)

    @pl.when(k == pl.num_programs(2) - 1)
    def _finalize():
        o_ref[...] = (acc_ref[...] + b_ref[...]).astype(o_ref.dtype)


def linear(x2d, w, b, *, block_m=None, block_n=None, block_k=None,
           out_dtype=None):
    """y = x2d @ w.T + b, tiled over (M, N, K) and software-pipelined."""
    M, K = x2d.shape
    N, K2 = w.shape
    assert K == K2
    out_dtype = out_dtype or x2d.dtype

    tm = block_m or _pick_tile(M, 512, 8)
    tn = block_n or _pick_tile(N, 256, 128)
    tk = block_k or _pick_tile(K, 512, 128)
    assert M % tm == 0 and N % tn == 0 and K % tk == 0

    b2 = b.reshape(1, N).astype(jnp.float32)    # bias fp32, added post-MXU

    return pl.pallas_call(
        _linear_kernel,
        out_shape=jax.ShapeDtypeStruct((M, N), out_dtype),
        grid_spec=pltpu.PrefetchScalarGridSpec(
            num_scalar_prefetch=0,
            grid=(M // tm, N // tn, K // tk),
            in_specs=[
                pl.BlockSpec((tm, tk), lambda i, j, k: (i, k)),
                pl.BlockSpec((tn, tk), lambda i, j, k: (j, k)),   # (N, K) as-is
                pl.BlockSpec((1, tn), lambda i, j, k: (0, j)),
            ],
            out_specs=pl.BlockSpec((tm, tn), lambda i, j, k: (i, j)),
            scratch_shapes=[pltpu.VMEM((tm, tn), jnp.float32)],
        ),
        compiler_params=pltpu.CompilerParams(
            dimension_semantics=("parallel", "parallel", "arbitrary"),
            vmem_limit_bytes=_vmem_limit_bytes(),
        ),
    )(x2d, w, b2)


# ---------------------------------------------------------------------------
# Kernel 2: flash-style causal attention, heads on the grid
# ---------------------------------------------------------------------------
def _flash_attn_kernel(qi_tbl, kv_tbl, q_ref, k_ref, v_ref, o_ref,
                       m_sc, l_sc, acc_sc, *, block_q, block_kv, head_dim):
    step = pl.program_id(2)
    qi = qi_tbl[step]          # q-block row for this step (triangular schedule)
    kv = kv_tbl[step]          # kv-block column for this step
    scale = 1.0 / math.sqrt(head_dim)

    @pl.when(kv == 0)
    def _init():
        m_sc[...] = jnp.full_like(m_sc, -1e30)
        l_sc[...] = jnp.zeros_like(l_sc)
        acc_sc[...] = jnp.zeros_like(acc_sc)

    def _update(masked):
        # Scale q (tq, hd) instead of s (tq, tk): fewer VALU multiplies.
        q = q_ref[...] * scale
        s = lax.dot_general(q, k_ref[...], (((1,), (1,)), ((), ())),
                            preferred_element_type=jnp.float32)     # (tq, tk)
        if masked:                       # only diagonal-straddling tiles
            row = qi * block_q + lax.broadcasted_iota(jnp.int32, s.shape, 0)
            col = kv * block_kv + lax.broadcasted_iota(jnp.int32, s.shape, 1)
            s = jnp.where(col <= row, s, -1e30)
        m_prev = m_sc[...]                                           # (tq, 1)
        m_new = jnp.maximum(m_prev, jnp.max(s, axis=-1, keepdims=True))
        alpha = jnp.exp(m_prev - m_new)                              # fp32
        p = jnp.exp(s - m_new)                                       # fp32
        l_sc[...] = alpha * l_sc[...] + jnp.sum(p, axis=-1, keepdims=True)
        acc_sc[...] = alpha * acc_sc[...] + jnp.dot(
            p.astype(v_ref.dtype), v_ref[...],
            preferred_element_type=jnp.float32)
        m_sc[...] = m_new

    # Mask only when the kv tile straddles the causal diagonal (absolute offsets,
    # valid for decoupled block_q / block_kv).
    needs_mask = (kv + 1) * block_kv - 1 > qi * block_q

    @pl.when(jnp.logical_not(needs_mask))
    def _full_tile():
        _update(masked=False)

    @pl.when(needs_mask)
    def _diag_tile():
        _update(masked=True)

    # Last kv block needed for this q row (triangular schedule guarantees it
    # is visited last), then one lane-dense (tq, hd) store.
    last_kv = ((qi + 1) * block_q - 1) // block_kv

    @pl.when(kv == last_kv)
    def _finalize():
        inv_l = 1.0 / l_sc[...]          # exact; once per output tile
        o_ref[...] = (acc_sc[...] * inv_l).astype(o_ref.dtype)


def flash_attention(qkv, n_head, *, block_q=None, block_kv=None,
                    out_dtype=None):
    """Causal flash attention reading q/k/v from the fused (B, T, 3C) c_attn
    output (no jnp.split, no per-head loop inside the kernel)."""
    B, T, C3 = qkv.shape
    C = C3 // 3
    assert 3 * C == C3 and C % n_head == 0
    H = n_head
    hd = C // n_head
    out_dtype = out_dtype or qkv.dtype

    tq = block_q or _pick_tile(T, 512, 8)
    tk = block_kv or _pick_tile(T, 256, 8)
    assert T % tq == 0 and T % tk == 0

    # Triangular (qi, kv) schedule: enumerate only tiles at/below the causal
    # diagonal; fed to the kernel / index_maps via scalar prefetch.
    qi_list, kv_list = [], []
    for qi in range(T // tq):
        for kv in range(((qi + 1) * tq - 1) // tk + 1):
            qi_list.append(qi)
            kv_list.append(kv)
    n_steps = len(qi_list)
    qi_tbl = jnp.asarray(qi_list, dtype=jnp.int32)
    kv_tbl = jnp.asarray(kv_list, dtype=jnp.int32)

    kernel = functools.partial(_flash_attn_kernel, block_q=tq, block_kv=tk,
                               head_dim=hd)
    scratch = [
        pltpu.VMEM((tq, 1), jnp.float32),     # running max m
        pltpu.VMEM((tq, 1), jnp.float32),     # running denom l
        pltpu.VMEM((tq, hd), jnp.float32),    # fp32 output accumulator
    ]
    cparams = pltpu.CompilerParams(
        dimension_semantics=("parallel", "parallel", "arbitrary"),
        vmem_limit_bytes=_vmem_limit_bytes(),
    )

    if hd % 128 == 0:
        # Lane-aligned head columns: index the fused (B, T, 3C) tensor directly
        # (column block h / H+h / 2H+h of width hd) and store straight into
        # (B, T, C).  Zero extra HBM passes.
        q_spec = pl.BlockSpec((None, tq, hd),
                              lambda b, h, s, qt, kt: (b, qt[s], h))
        k_spec = pl.BlockSpec((None, tk, hd),
                              lambda b, h, s, qt, kt: (b, kt[s], H + h))
        v_spec = pl.BlockSpec((None, tk, hd),
                              lambda b, h, s, qt, kt: (b, kt[s], 2 * H + h))
        o_spec = pl.BlockSpec((None, tq, hd),
                              lambda b, h, s, qt, kt: (b, qt[s], h))
        return pl.pallas_call(
            kernel,
            out_shape=jax.ShapeDtypeStruct((B, T, C), out_dtype),
            grid_spec=pltpu.PrefetchScalarGridSpec(
                num_scalar_prefetch=2,
                grid=(B, H, n_steps),
                in_specs=[q_spec, k_spec, v_spec],
                out_specs=o_spec,
                scratch_shapes=scratch,
            ),
            compiler_params=cparams,
        )(qi_tbl, kv_tbl, qkv, qkv, qkv)

    # hd not a lane multiple: one-time head-major transpose so every attention
    # block is a contiguous, lane-dense (seq_tile, hd) slab.
    qkvh = qkv.reshape(B, T, 3 * H, hd).transpose(0, 2, 1, 3)   # (B, 3H, T, hd)
    q_spec = pl.BlockSpec((None, None, tq, hd),
                          lambda b, h, s, qt, kt: (b, h, qt[s], 0))
    k_spec = pl.BlockSpec((None, None, tk, hd),
                          lambda b, h, s, qt, kt: (b, H + h, kt[s], 0))
    v_spec = pl.BlockSpec((None, None, tk, hd),
                          lambda b, h, s, qt, kt: (b, 2 * H + h, kt[s], 0))
    o_spec = pl.BlockSpec((None, None, tq, hd),
                          lambda b, h, s, qt, kt: (b, h, qt[s], 0))
    out = pl.pallas_call(
        kernel,
        out_shape=jax.ShapeDtypeStruct((B, H, T, hd), out_dtype),
        grid_spec=pltpu.PrefetchScalarGridSpec(
            num_scalar_prefetch=2,
            grid=(B, H, n_steps),
            in_specs=[q_spec, k_spec, v_spec],
            out_specs=o_spec,
            scratch_shapes=scratch,
        ),
        compiler_params=cparams,
    )(qi_tbl, kv_tbl, qkvh, qkvh, qkvh)
    return out.transpose(0, 2, 1, 3).reshape(B, T, C)


# ---------------------------------------------------------------------------
# Full forward pass
# ---------------------------------------------------------------------------
def causal_self_attention(x, params, n_head, *, compute_dtype=None,
                          block_q=None, block_kv=None, block_m=None):
    B, T, C = x.shape
    assert C % n_head == 0
    in_dtype = x.dtype
    if compute_dtype is None:
        # bf16 MXU operands by default for fp32 models (native on every TPU
        # generation); softmax math / accumulation stay fp32 in-kernel.
        cdt = jnp.bfloat16 if in_dtype == jnp.float32 else in_dtype
    else:
        cdt = compute_dtype

    xc = x.astype(cdt)
    # NOTE: in a real model store the weights in `cdt` so these casts vanish.
    w_attn = params["w_attn"].astype(cdt)
    w_proj = params["w_proj"].astype(cdt)
    b_attn = params["b_attn"]
    b_proj = params["b_proj"]

    # fused qkv projection
    qkv = linear(xc.reshape(B * T, C), w_attn, b_attn, block_m=block_m)
    qkv = qkv.reshape(B, T, 3 * C)

    # causal flash attention straight off the fused qkv tensor
    y = flash_attention(qkv, n_head, block_q=block_q, block_kv=block_kv)
    # TODO(synk): attn_pdrop dropout (training mode) not implemented (eval identity).

    # output projection
    out = linear(y.reshape(B * T, C), w_proj, b_proj, block_m=block_m)
    # TODO(synk): resid_pdrop dropout (training mode) not implemented (eval identity).
    return out.reshape(B, T, C).astype(in_dtype)


# ---------------------------------------------------------------------------
# Pure-JAX reference (sanity check)
# ---------------------------------------------------------------------------
def reference(x, params, n_head):
    B, T, C = x.shape
    hd = C // n_head
    qkv = x @ params["w_attn"].T + params["b_attn"]
    q, k, v = jnp.split(qkv, 3, axis=-1)
    q = q.reshape(B, T, n_head, hd).transpose(0, 2, 1, 3)
    k = k.reshape(B, T, n_head, hd).transpose(0, 2, 1, 3)
    v = v.reshape(B, T, n_head, hd).transpose(0, 2, 1, 3)
    att = (q @ jnp.swapaxes(k, -1, -2)) / math.sqrt(hd)
    mask = jnp.tril(jnp.ones((T, T), dtype=bool))
    att = jnp.where(mask[None, None], att, -jnp.inf)
    att = jax.nn.softmax(att, axis=-1)
    y = (att @ v).transpose(0, 2, 1, 3).reshape(B, T, C)
    return y @ params["w_proj"].T + params["b_proj"]


if __name__ == "__main__":
    key = jax.random.PRNGKey(0)
    ks = jax.random.split(key, 10)

    # config A: n_embd=32, n_head=4 (head_dim=8 -> head-major attention path)
    B, T, C, H = 2, 8, 32, 4
    x = jax.random.normal(ks[0], (B, T, C), dtype=jnp.float32)
    params = {
        "w_attn": jax.random.normal(ks[1], (3 * C, C), dtype=jnp.float32) * 0.02,
        "b_attn": jax.random.normal(ks[2], (3 * C,), dtype=jnp.float32) * 0.02,
        "w_proj": jax.random.normal(ks[3], (C, C), dtype=jnp.float32) * 0.02,
        "b_proj": jax.random.normal(ks[4], (C,), dtype=jnp.float32) * 0.02,
    }

    # 1) fp32 compute, single-tile grids
    out = jax.block_until_ready(
        causal_self_attention(x, params, H, compute_dtype=jnp.float32))
    ref = reference(x, params, H)
    assert out.shape == (B, T, C)
    assert jnp.allclose(out, ref, atol=1e-4, rtol=1e-4), "fp32 mismatch"

    # 2) fp32 compute, multi-tile: triangular kv schedule, decoupled q/kv
    #    tiles, tiled linears.
    T2 = 64
    x2 = jax.random.normal(ks[5], (B, T2, C), dtype=jnp.float32)
    out2 = jax.block_until_ready(
        causal_self_attention(x2, params, H, compute_dtype=jnp.float32,
                              block_q=16, block_kv=32, block_m=32))
    ref2 = reference(x2, params, H)
    assert jnp.allclose(out2, ref2, atol=1e-4, rtol=1e-4), "tiled fp32 mismatch"

    # 3) default path: bf16 MXU operands, fp32 softmax / accumulation
    out_bf = jax.block_until_ready(causal_self_attention(x, params, H))
    assert out_bf.shape == (B, T, C)
    assert jnp.allclose(out_bf, ref, atol=5e-2, rtol=5e-2), "bf16 mismatch"

    # config B: head_dim=128 -> lane-aligned path reading fused qkv directly
    B3, T3, C3, H3 = 1, 32, 256, 2
    x3 = jax.random.normal(ks[6], (B3, T3, C3), dtype=jnp.float32)
    params3 = {
        "w_attn": jax.random.normal(ks[7], (3 * C3, C3), dtype=jnp.float32) * 0.02,
        "b_attn": jnp.zeros((3 * C3,), dtype=jnp.float32),
        "w_proj": jax.random.normal(ks[8], (C3, C3), dtype=jnp.float32) * 0.02,
        "b_proj": jnp.zeros((C3,), dtype=jnp.float32),
    }
    out3 = jax.block_until_ready(
        causal_self_attention(x3, params3, H3, compute_dtype=jnp.float32,
                              block_q=16, block_kv=16))
    ref3 = reference(x3, params3, H3)
    assert jnp.allclose(out3, ref3, atol=1e-3, rtol=1e-3), "hd=128 mismatch"

    print("KERNEL_OK")
</pallas_src>

<mosaic_0001>
module attributes {stable_mosaic.version = 11 : i64} {
  func.func @_linear_kernel(%arg0: i32, %arg1: i32, %arg2: i32, %arg3: memref<16x32xf32, #tpu.memory_space<vmem>>, %arg4: memref<96x32xf32, #tpu.memory_space<vmem>>, %arg5: memref<1x96xf32, #tpu.memory_space<vmem>>, %arg6: memref<16x96xf32, #tpu.memory_space<vmem>>, %arg7: memref<16x96xf32, #tpu.memory_space<vmem>>) attributes {dimension_semantics = [#tpu.dimension_semantics<parallel>, #tpu.dimension_semantics<parallel>, #tpu.dimension_semantics<arbitrary>], iteration_bounds = array<i64: 1, 1, 1>, scalar_prefetch = 0 : i64, scratch_operands = 1 : i64, tpu.core_type = #tpu.core_type<tc>, window_params = [{transform_indices = @transform_0, window_bounds = array<i64: 16, 32>}, {transform_indices = @transform_1, window_bounds = array<i64: 96, 32>}, {transform_indices = @transform_2, window_bounds = array<i64: 1, 96>}, {transform_indices = @transform_3, window_bounds = array<i64: 16, 96>}]} {
    %c0_i32 = arith.constant 0 : i32
    %0 = arith.cmpi eq, %arg2, %c0_i32 : i32
    %1 = arith.extui %0 : i1 to i32
    %c0_i32_0 = arith.constant 0 : i32
    %2 = arith.cmpi ne, %1, %c0_i32_0 : i32
    scf.if %2 {
      %cst_10 = arith.constant 0.000000e+00 : f32
      %12 = vector.broadcast %cst_10 : f32 to vector<16x96xf32>
      %c0_11 = arith.constant 0 : index
      %c0_12 = arith.constant 0 : index
      %13 = vector.load %arg7[%c0_11, %c0_12] : memref<16x96xf32, #tpu.memory_space<vmem>>, vector<16x96xf32>
      tpu.vector_store %arg7[%c0_11, %c0_12], %12 {strides = array<i32>} : memref<16x96xf32, #tpu.memory_space<vmem>>, vector<16x96xf32>,
    } else {
    }
    %c0 = arith.constant 0 : index
    %c0_1 = arith.constant 0 : index
    %3 = vector.load %arg7[%c0, %c0_1] : memref<16x96xf32, #tpu.memory_space<vmem>>, vector<16x96xf32>
    %c0_2 = arith.constant 0 : index
    %c0_3 = arith.constant 0 : index
    %4 = vector.load %arg3[%c0_2, %c0_3] : memref<16x32xf32, #tpu.memory_space<vmem>>, vector<16x32xf32>
    %c0_4 = arith.constant 0 : index
    %c0_5 = arith.constant 0 : index
    %5 = vector.load %arg4[%c0_4, %c0_5] : memref<96x32xf32, #tpu.memory_space<vmem>>, vector<96x32xf32>
    %cst = arith.constant dense<0.000000e+00> : vector<16x96xf32>
    %6 = tpu.matmul %4, %5, %cst {dimension_numbers = #tpu.dot_dimension_numbers<[1], [1], [0], [0], [0, 0, 1, 0], [], []>} : vector<16x32xf32>, vector<96x32xf32>, vector<16x96xf32> -> vector<16x96xf32>
    %7 = arith.addf %3, %6 : vector<16x96xf32>
    %c0_6 = arith.constant 0 : index
    %c0_7 = arith.constant 0 : index
    %8 = vector.load %arg7[%c0_6, %c0_7] : memref<16x96xf32, #tpu.memory_space<vmem>>, vector<16x96xf32>
    tpu.vector_store %arg7[%c0_6, %c0_7], %7 {strides = array<i32>} : memref<16x96xf32, #tpu.memory_space<vmem>>, vector<16x96xf32>,
    %c0_i32_8 = arith.constant 0 : i32
    %9 = arith.cmpi eq, %arg2, %c0_i32_8 : i32
    %10 = arith.extui %9 : i1 to i32
    %c0_i32_9 = arith.constant 0 : i32
    %11 = arith.cmpi ne, %10, %c0_i32_9 : i32
    scf.if %11 {
      %c0_10 = arith.constant 0 : index
      %c0_11 = arith.constant 0 : index
      %12 = vector.load %arg7[%c0_10, %c0_11] : memref<16x96xf32, #tpu.memory_space<vmem>>, vector<16x96xf32>
      %c0_12 = arith.constant 0 : index
      %c0_13 = arith.constant 0 : index
      %13 = vector.load %arg5[%c0_12, %c0_13] : memref<1x96xf32, #tpu.memory_space<vmem>>, vector<1x96xf32>
      %14 = vector.broadcast %13 : vector<1x96xf32> to vector<16x96xf32>
      %15 = arith.addf %12, %14 : vector<16x96xf32>
      %c0_14 = arith.constant 0 : index
      %c0_15 = arith.constant 0 : index
      %16 = vector.load %arg6[%c0_14, %c0_15] : memref<16x96xf32, #tpu.memory_space<vmem>>, vector<16x96xf32>
      tpu.vector_store %arg6[%c0_14, %c0_15], %15 {strides = array<i32>} : memref<16x96xf32, #tpu.memory_space<vmem>>, vector<16x96xf32>,
    } else {
    }
    return
  }
  func.func @transform_0(%arg0: i32, %arg1: i32, %arg2: i32) -> (i32, i32) {
    %c0_i32 = arith.constant 0 : i32
    return %arg0, %arg2 : i32, i32
  }
  func.func @transform_1(%arg0: i32, %arg1: i32, %arg2: i32) -> (i32, i32) {
    %c0_i32 = arith.constant 0 : i32
    return %arg1, %arg2 : i32, i32
  }
  func.func @transform_2(%arg0: i32, %arg1: i32, %arg2: i32) -> (i32, i32) {
    %c0_i32 = arith.constant 0 : i32
    %c0_i32_0 = arith.constant 0 : i32
    return %c0_i32, %arg1 : i32, i32
  }
  func.func @transform_3(%arg0: i32, %arg1: i32, %arg2: i32) -> (i32, i32) {
    %c0_i32 = arith.constant 0 : i32
    return %arg0, %arg1 : i32, i32
  }
}

</mosaic_0001>

<bundles_post_ra>
// kernel: tpu_custom_call.1
= control target key start
LH: loop header
LB: loop body
LE: loop exit
PB: predicated region body
PF: predicated region fallthrough
CT: control target
= control target key end

     0   :  { %vm38_vm0 = vcmask 261120   ;;  %vm19_vm1 = vcmask 785408   ;;  %v313_v6 = vmov 0.0   ;;  %s432_s0 = inlined_call_operand.vmem [shape: f32[16,32], index: 0, kind: input, shape index: {}]   ;;  %s433_s1 = inlined_call_operand.vmem [shape: f32[96,32], index: 1, kind: input, shape index: {}]   ;;  %s434_s2 = inlined_call_operand.vmem [shape: f32[1,96], index: 2, kind: input, shape index: {}]   ;;  %s435_s3 = inlined_call_operand.hbm [shape: f32[16,96], index: 3, kind: output, shape index: {}]  }
   0x1   :  { %v26_v0 = vld [vmem:[%s433_s1] sm:$0xff]  ;;  %v27_v1 = vld [vmem:[%s433_s1 + $0x8] sm:$0xff]  ;;  %v28_v2 = vld [vmem:[%s433_s1 + $0x10] sm:$0xff]  ;;  %21 = vst.msk [vmem:[#allocation2 + $0x8] sm:$0xff] %vm19_vm1, %v313_v6 }
   0x2   :  { %v249_v3 = vpack.c.bf16 %v27_v1, %v26_v0  ;;  %vm348_vm2 = vmpackc.low %vm38_vm0, %vm38_vm0  ;;  %v29_v5 = vld [vmem:[%s433_s1 + $0x18] sm:$0xff]  ;;  %20 = vst.msk [vmem:[#allocation2] sm:$0xff] %vm19_vm1, %v313_v6  ;;  %v24_v8 = vld [vmem:[%s432_s0] sm:$0xff] }
   0x3   :  { %v255_v7 = vpack.c.bf16 %v29_v5, %v28_v2  ;;  %246 = vmatprep.mubr.msk.f32.mxu0 %vm38_vm0, %v24_v8 }
   0x4   :  { %251 = vmatprep.subr.msk.bf16.mxu0 %vm348_vm2, %v249_v3 }
   0x5   :  { %254 = vmatpush3.bf16.xpose.msk.msra.mxu0 %vm348_vm2, %v249_v3 }
   0x6   :  { %257 = vmatprep.subr.msk.bf16.mxu0 %vm348_vm2, %v255_v7 }
   0x7   :  { %8 = vsyncpa [#allocation4], 0  ;;  %v30_v9 = vld [vmem:[%s433_s1 + $0x20] sm:$0xff]  ;;  %v31_v10 = vld [vmem:[%s433_s1 + $0x28] sm:$0xff]  ;;  %s314_s14 = smov [#allocation3]  }
   0x8   :  { %v261_v11 = vpack.c.bf16 %v31_v10, %v30_v9  ;;  %v32_v12 = vld [vmem:[%s433_s1 + $0x30] sm:$0xff]  ;;  %v33_v13 = vld [vmem:[%s433_s1 + $0x38] sm:$0xff]  ;;  %v34_v15 = vld [vmem:[%s433_s1 + $0x40] sm:$0xff]  ;;  %s182_s15 = sshll.u32 %s314_s14, 4  ;;  %s183_s15 = int_to_ptr.vmem [resolvable:$true] %s182_s15 }
   0x9   :  { %v267_v14 = vpack.c.bf16 %v33_v13, %v32_v12  ;;  %v35_v16 = vld [vmem:[%s433_s1 + $0x48] sm:$0xff]  ;;  %v36_v18 = vld [vmem:[%s433_s1 + $0x50] sm:$0xff]  ;;  %v37_v19 = vld [vmem:[%s433_s1 + $0x58] sm:$0xff]  ;;  %p294_p1 = scmp.lt.s32.totalorder %s183_s15, %s183_s15 }
   0xa   :  { %v273_v17 = vpack.c.bf16 %v35_v16, %v34_v15  ;;  %v279_v20 = vpack.c.bf16 %v37_v19, %v36_v18  ;;  %v25_v21 = vld [vmem:[%s432_s0 + $0x8] sm:$0xff]  ;;  %v22_v23 = vld [vmem:[#allocation2] sm:$0xff]  ;;  %s289_s0 = scalar_lea.vmem %s183_s15, 256 }
   0xb   :  { %v23_v22 = vld [vmem:[#allocation2 + $0x8] sm:$0xff]  ;;  %v207_v28 = vld [vmem:[%s434_s2] ss:$0 sm:$0xff]  ;;  %p290_p0 = scmp.ne.s32.totalorder %s183_s15, %s289_s0  ;;  %p295_p2 = scmp.lt.s32.totalorder %s289_s0, %s289_s0 }
   0xd   :  { %260 = vmatpush3.bf16.xpose.msk.msra.mxu0 %vm348_vm2, %v255_v7  ;;  %p296_p3 = por %p295_p2, %p294_p1 }
   0xe   :  { %263 = vmatprep.subr.msk.bf16.mxu0 %vm348_vm2, %v261_v11 }
   0xf   :  { %p297_p4 = pnand %p296_p3, %p290_p0 }
  0x15   :  { %266 = vmatpush3.bf16.xpose.msk.msra.mxu0 %vm348_vm2, %v261_v11 }
  0x16   :  { %269 = vmatprep.subr.msk.bf16.mxu0 %vm348_vm2, %v267_v14 }
  0x1d   :  { %272 = vmatpush3.bf16.xpose.msk.msra.mxu0 %vm348_vm2, %v267_v14 }
  0x1e   :  { %275 = vmatprep.subr.msk.bf16.mxu0 %vm348_vm2, %v273_v17 }
  0x25   :  { %278 = vmatpush3.bf16.xpose.msk.msra.mxu0 %vm348_vm2, %v273_v17 }
  0x26   :  { %281 = vmatprep.subr.msk.bf16.mxu0 %vm348_vm2, %v279_v20 }
  0x2d   :  { %284 = vmatpush3.bf16.xpose.msk.msra.mxu0 %vm348_vm2, %v279_v20 }
  0x34   :  { %247 = vmatmul.mubr.msk.f32.vlgmr.msra.gmra.mrb[0].mxu0 %vm38_vm0, %v25_v21 }
 0x107   :  { %v248_v24 = vpop.f32.mrb[0].mxu0 }
 0x108   :  { %v157_v25 = vadd.f32 %v248_v24, %v23_v22  ;;  %v147_v26 = vpop.f32.mrb[1].mxu0 }
 0x109   :  { %v156_v27 = vadd.f32 %v147_v26, %v22_v23 }
 0x10a   :  { %160 = vst.msk [vmem:[#allocation2 + $0x8] sm:$0xff] %vm19_vm1, %v157_v25 }
 0x10b   :  { %159 = vst.msk [vmem:[#allocation2] sm:$0xff] %vm19_vm1, %v156_v27 }
 0x111   :  { %v165_v29 = vld [vmem:[#allocation2 + $0x8] sm:$0xff] }
 0x112   :  { %v164_v30 = vld [vmem:[#allocation2] sm:$0xff]  ;;  %v174_v31 = vadd.f32 %v207_v28, %v165_v29 }
 0x113   :  { %v173_v32 = vadd.f32 %v207_v28, %v164_v30 }
 0x114   :  { %176 = vst.msk [vmem:[#allocation3 + $0x8] sm:$0xff] %vm19_vm1, %v174_v31 }
 0x115   :  { %175 = vst.msk [vmem:[#allocation3] sm:$0xff] %vm19_vm1, %v173_v32 }
 0x116   :  { %300 = shalt.err (!%p297_p4)
}
 0x117   :  { %s301_s17 = scalar_lea.hbm %s435_s3, 256 }
 0x118   :  { %p302_p5 = scmp.ne.s32.totalorder %s435_s3, %s301_s17  ;;  %p305_p6 = scmp.lt.u32.totalorder %s301_s17, %s435_s3 }
 0x11a   :  { %p307_p7 = pnand %p305_p6, %p302_p5 }
 0x11c   :  { %310 = shalt.err (!%p307_p7)
}
 0x11d   :  { %s315_s22 = smov 128   ;;  %s316_s23 = smov 8  }
 0x11e   :  { %188 = dma.vmem_to_hbm [thread:$0]  %s183_s15, 256, %s435_s3, [#allocation4], %s315_s22, %s315_s22, %s316_s23  }
 0x11f   :  { %311 = dma.done.wait [#allocation4], 256  }
 0x120   :  { %312 = vsyncadd [#allocation4], 4294967040 }
 0x121   :  { %192 = vsyncpa [#allocation4], 1 }

</bundles_post_ra>
